<compile_context>
chip_gen: v7x
topology: tpu7x:2x2x1
jax: 0.10.0
libtpu: 0.0.40
codegen_flags: <defaults>
</compile_context>

<pallas_src>
import functools
import numpy as np

import jax
import jax.numpy as jnp
from jax.experimental import pallas as pl
from jax.experimental.pallas import tpu as pltpu


# ----------------------------------------------------------------------------
# Config (shapes scaled down from the production 8192/1364/256 values so that
# this synthetic test stays tiny; the kernel structure handles both).
# ----------------------------------------------------------------------------
class Config:
    orig_sample_rate = 44100
    sample_rate = 44100
    window_length = 256      # production: 8192
    hop_length = 64          # production: 1364
    n_fft = 256              # production: 8192
    n_mels = 128             # production: 256
    f_min = 0.0
    f_max = None
    n_classes = 10
    in_channels = 1


def _round_up(x: int, m: int) -> int:
    return ((x + m - 1) // m) * m


# ----------------------------------------------------------------------------
# Deterministic constant builders (numpy, no files)
# ----------------------------------------------------------------------------
def _hann_window(win_length: int) -> np.ndarray:
    n = np.arange(win_length, dtype=np.float64)
    return 0.5 - 0.5 * np.cos(2.0 * np.pi * n / win_length)   # periodic Hann


def _mel_filterbank(sample_rate, n_fft, n_mels, f_min, f_max) -> np.ndarray:
    """HTK mel filterbank, norm=None (torchaudio defaults), shape [n_freq, n_mels]."""
    n_freq = n_fft // 2 + 1
    f_max = f_max if f_max is not None else sample_rate / 2.0

    def hz_to_mel(f):
        return 2595.0 * np.log10(1.0 + f / 700.0)

    def mel_to_hz(m):
        return 700.0 * (10.0 ** (m / 2595.0) - 1.0)

    all_freqs = np.linspace(0, sample_rate // 2, n_freq)
    m_pts = np.linspace(hz_to_mel(f_min), hz_to_mel(f_max), n_mels + 2)
    f_pts = mel_to_hz(m_pts)
    f_diff = f_pts[1:] - f_pts[:-1]                       # (n_mels+1,)
    slopes = f_pts[None, :] - all_freqs[:, None]          # (n_freq, n_mels+2)
    down = -slopes[:, :-2] / f_diff[:-1]
    up = slopes[:, 2:] / f_diff[1:]
    return np.maximum(0.0, np.minimum(down, up))          # (n_freq, n_mels)


# ----------------------------------------------------------------------------
# Pallas kernels
# ----------------------------------------------------------------------------
def _logmel_kernel(rows_ref, basis_ref, fb_ref, out_ref, frames_ref, acc_ref, *,
                   bB, t_pad, R, hop_pad, fT):
    """Fused frame-assembly -> windowed |DFT|^2 -> mel filterbank -> log.

    Grid = (batch_group, freq_tile).  The bf16 frame matrix for the whole
    batch group is assembled ONCE (fi == 0) into a VMEM scratch with
    lane-aligned copies; every freq tile then runs one wide MXU matmul against
    the merged [cos|sin] basis.  The mel output is accumulated into an f32
    VMEM scratch across freq tiles (assign on the first tile) and stored on
    the last tile.
    """
    fi = pl.program_id(1)
    n_f = pl.num_programs(1)

    @pl.when(fi == 0)
    def _assemble():
        # frame t of batch b = concat_r rows[b, t+r, :hop]; static, lane-aligned
        # slices only (hop_pad is a multiple of 128, t_pad a multiple of 16).
        for b in range(bB):
            for r in range(R):
                frames_ref[b * t_pad:(b + 1) * t_pad,
                           r * hop_pad:(r + 1) * hop_pad] = (
                    rows_ref[b, r:r + t_pad, :].astype(jnp.bfloat16))

    # One wide matmul: [M, K_pad] x [K_pad, 2*fT] -> [M, 2*fT] (cos | sin).
    ri = jnp.dot(frames_ref[...], basis_ref[...],
                 preferred_element_type=jnp.float32)
    re = ri[:, :fT]
    im = ri[:, fT:]
    power = re * re + im * im                              # f32 on the VPU
    partial = jnp.dot(power.astype(jnp.bfloat16), fb_ref[...],
                      preferred_element_type=jnp.float32)

    @pl.when(fi == 0)
    def _first():
        acc_ref[...] = partial                             # assign, no zero-fill

    @pl.when(fi > 0)
    def _accum():
        acc_ref[...] += partial

    @pl.when(fi == n_f - 1)
    def _finalize():
        out_ref[...] = jnp.log(acc_ref[...] + 1e-5).astype(out_ref.dtype)


def _head_kernel(x_ref, w_ref, b_ref, o_ref, *, n_frames):
    """Mean-pool over valid frames + linear classifier (stand-in for the NTU model)."""
    # n_frames is a static Python int -> static slice, no iota/where masking.
    x = x_ref[:, :n_frames, :].astype(jnp.float32)          # (B, n_frames, n_mels)
    feats = jnp.sum(x, axis=1) * (1.0 / n_frames)           # (B, n_mels)
    o_ref[...] = (jnp.dot(feats, w_ref[...], preferred_element_type=jnp.float32)
                  + b_ref[...])


# ----------------------------------------------------------------------------
# JAX wrapper (the "Baseline" forward)
# ----------------------------------------------------------------------------
class BaselinePallas:
    def __init__(self, config: Config):
        self.cfg = cfg = config
        n_fft, hop, n_mels = cfg.n_fft, cfg.hop_length, cfg.n_mels
        n_freq = n_fft // 2 + 1

        # Mel filterbank; trim trailing freq bins whose mel weights are all
        # (numerically) zero -- exact, and drops the Nyquist bin when f_max=sr/2.
        fb = _mel_filterbank(cfg.sample_rate, n_fft, n_mels, cfg.f_min, cfg.f_max)
        nz = np.nonzero(fb.max(axis=1) > 1e-10)[0]
        f_used = int(nz[-1]) + 1 if nz.size else n_freq
        if f_used <= 512:
            f_pad = _round_up(f_used, 128)
            fT = f_pad                        # single freq tile
        else:
            fT = 256                          # v7x-safe freq tile (64 MiB VMEM)
            f_pad = _round_up(f_used, fT)
        self.f_pad, self.fT = f_pad, fT
        self.n_freq_tiles = f_pad // fT

        # Frames span R hop-sized rows; each hop row is zero-padded to hop_pad
        # (multiple of 128 lanes) so every frame-assembly copy is lane-aligned.
        self.R = R = -(-n_fft // hop)
        self.hop_pad = hop_pad = _round_up(hop, 128)
        self.K_pad = K_pad = R * hop_pad

        # Periodic Hann window (center-padded to n_fft if shorter), folded
        # directly into the DFT bases.
        win = _hann_window(cfg.window_length)
        w = np.zeros(n_fft, np.float64)
        off = (n_fft - cfg.window_length) // 2
        w[off:off + cfg.window_length] = win

        j = np.arange(n_fft)
        k = np.arange(f_used, dtype=np.float64)[None, :]
        ang = 2.0 * np.pi * j[:, None].astype(np.float64) * k / n_fft
        cos_b = w[:, None] * np.cos(ang)                   # (n_fft, f_used)
        sin_b = w[:, None] * np.sin(ang)

        # Scatter sample j -> K position (j//hop)*hop_pad + (j%hop); the rows
        # corresponding to the hop padding (and hop*R > n_fft overhang) stay 0.
        kpos = (j // hop) * hop_pad + (j % hop)
        cos_k = np.zeros((K_pad, f_pad), np.float64)
        sin_k = np.zeros((K_pad, f_pad), np.float64)
        cos_k[kpos, :f_used] = cos_b
        sin_k[kpos, :f_used] = sin_b

        # Merge [cos | sin] per freq tile -> one input stream / one MXU matmul.
        basis = np.zeros((K_pad, self.n_freq_tiles * 2 * fT), np.float32)
        for f in range(self.n_freq_tiles):
            basis[:, f * 2 * fT:        f * 2 * fT + fT] = cos_k[:, f * fT:(f + 1) * fT]
            basis[:, f * 2 * fT + fT:   (f + 1) * 2 * fT] = sin_k[:, f * fT:(f + 1) * fT]

        fb_pad = np.zeros((f_pad, n_mels), np.float32)
        fb_pad[:f_used] = fb[:f_used]

        # bf16 MXU operands; accumulation stays f32 inside the kernel dots.
        self.basis = jnp.asarray(basis, dtype=jnp.bfloat16)
        self.mel_fb = jnp.asarray(fb_pad, dtype=jnp.bfloat16)

        # Deterministic stand-in classifier parameters.
        kw, _ = jax.random.split(jax.random.PRNGKey(42))
        self.head_w = (0.02 * jax.random.normal(
            kw, (n_mels, cfg.n_classes))).astype(jnp.float32)
        self.head_b = jnp.zeros((1, cfg.n_classes), jnp.float32)

    # -------------------- log-mel spectrogram (time-major) -------------------
    def _logmel_time_major(self, waveform: jax.Array):
        cfg = self.cfg
        B, C, n_samples = waveform.shape
        assert C == cfg.in_channels == 1
        hop, n_fft, n_mels = cfg.hop_length, cfg.n_fft, cfg.n_mels
        R, hop_pad, K_pad = self.R, self.hop_pad, self.K_pad
        f_pad, fT, nF = self.f_pad, self.fT, self.n_freq_tiles

        wave = waveform[:, 0, :].astype(jnp.float32)              # (B, N)
        # center=True, pad_mode="reflect" (torch.stft semantics)
        p = n_fft // 2
        padded = jnp.pad(wave, ((0, 0), (p, p)), mode="reflect")

        n_frames = n_samples // hop + 1
        t_pad = _round_up(n_frames, 16)                # single time tile per clip
        n_hops = _round_up(t_pad + R - 1, 8)
        need = n_hops * hop
        cur = padded.shape[1]
        if need > cur:
            padded = jnp.pad(padded, ((0, 0), (0, need - cur)))
        else:
            padded = padded[:, :need]
        rows = padded.reshape(B, n_hops, hop)
        if hop_pad > hop:
            rows = jnp.pad(rows, ((0, 0), (0, 0), (0, hop_pad - hop)))

        # Fold bB batch items into the matmul M dimension: one basis read per
        # group instead of one per batch item, and M = bB * t_pad >= ~128.
        bB = max(1, min(B, -(-384 // t_pad)))
        while B % bB:
            bB -= 1
        G = B // bB
        M_tile = bB * t_pad
        # TODO(synk): for very long clips (M_tile * K_pad bf16 >> 8 MB) a time
        # tile axis should be re-introduced; 1-second DCASE clips do not need it.

        M_total = B * t_pad
        flops = int(M_total * (2 * K_pad * 2 * f_pad + 3 * f_pad + 2 * f_pad * n_mels))
        bytes_accessed = int(rows.size * 4
                             + G * (self.basis.size * 2 + self.mel_fb.size * 2)
                             + M_total * n_mels * 4)

        logmel2d = pl.pallas_call(
            functools.partial(_logmel_kernel, bB=bB, t_pad=t_pad, R=R,
                              hop_pad=hop_pad, fT=fT),
            out_shape=jax.ShapeDtypeStruct((M_total, n_mels), jnp.float32),
            grid=(G, nF),
            in_specs=[
                pl.BlockSpec((bB, n_hops, hop_pad), lambda g, f: (g, 0, 0)),
                pl.BlockSpec((K_pad, 2 * fT), lambda g, f: (0, f)),
                pl.BlockSpec((fT, n_mels), lambda g, f: (f, 0)),
            ],
            out_specs=pl.BlockSpec((M_tile, n_mels), lambda g, f: (g, 0)),
            scratch_shapes=[
                pltpu.VMEM((M_tile, K_pad), jnp.bfloat16),    # cached frames
                pltpu.VMEM((M_tile, n_mels), jnp.float32),    # mel accumulator
            ],
            compiler_params=pltpu.CompilerParams(
                dimension_semantics=("parallel", "arbitrary"),
                vmem_limit_bytes=48 * 1024 * 1024),
            cost_estimate=pl.CostEstimate(
                flops=flops,
                transcendentals=int(M_total * n_mels),
                bytes_accessed=bytes_accessed),
        )(rows, self.basis, self.mel_fb)

        logmel = logmel2d.reshape(B, t_pad, n_mels)
        return logmel, n_frames

    # -------------------- torchaudio-layout preprocess (external API) --------
    def preprocess(self, waveform: jax.Array) -> jax.Array:
        """waveform [B,1,N] -> log-mel [B,1,n_mels,T] (fp16), torch layout."""
        logmel, n_frames = self._logmel_time_major(waveform)
        out = jnp.transpose(logmel[:, :n_frames, :], (0, 2, 1))[:, None]
        return out.astype(jnp.float16)

    # -------------------- classifier head -------------------------------------
    def _head(self, logmel: jax.Array, n_frames: int) -> jax.Array:
        cfg = self.cfg
        B, t_pad, n_mels = logmel.shape
        logits = pl.pallas_call(
            functools.partial(_head_kernel, n_frames=n_frames),
            out_shape=jax.ShapeDtypeStruct((B, cfg.n_classes), jnp.float32),
            grid=(1,),
            in_specs=[
                pl.BlockSpec((B, t_pad, n_mels), lambda i: (0, 0, 0)),
                pl.BlockSpec((n_mels, cfg.n_classes), lambda i: (0, 0)),
                pl.BlockSpec((1, cfg.n_classes), lambda i: (0, 0)),
            ],
            out_specs=pl.BlockSpec((B, cfg.n_classes), lambda i: (0, 0)),
        )(logmel, self.head_w, self.head_b)
        return logits.astype(jnp.float16)              # model is .half()

    # -------------------- full forward ----------------------------------------
    def __call__(self, waveform: jax.Array) -> jax.Array:
        # Internal path keeps the time-major [B, T, n_mels] layout end-to-end.
        logmel, n_frames = self._logmel_time_major(waveform)
        return self._head(logmel, n_frames)


# ----------------------------------------------------------------------------
if __name__ == "__main__":
    cfg = Config()
    model = BaselinePallas(cfg)

    B = 2
    n_samples = 2048
    key = jax.random.PRNGKey(0)
    waveform = jax.random.normal(key, (B, cfg.in_channels, n_samples),
                                 dtype=jnp.float32)

    logits = jax.block_until_ready(model(waveform))

    assert logits.shape == (B, cfg.n_classes), logits.shape
    assert logits.dtype == jnp.float16, logits.dtype
    assert bool(jnp.all(jnp.isfinite(logits.astype(jnp.float32))))
    print("KERNEL_OK")
</pallas_src>

<mosaic_0001>
module attributes {stable_mosaic.version = 11 : i64} {
  func.func @_logmel_kernel(%arg0: i32, %arg1: i32, %arg2: memref<2x56x128xf32, #tpu.memory_space<vmem>>, %arg3: memref<512x256xbf16, #tpu.memory_space<vmem>>, %arg4: memref<128x128xbf16, #tpu.memory_space<vmem>>, %arg5: memref<96x128xf32, #tpu.memory_space<vmem>>, %arg6: memref<96x512xbf16, #tpu.memory_space<vmem>>, %arg7: memref<96x128xf32, #tpu.memory_space<vmem>>) attributes {dimension_semantics = [#tpu.dimension_semantics<parallel>, #tpu.dimension_semantics<arbitrary>], iteration_bounds = array<i64: 1, 1>, scalar_prefetch = 0 : i64, scratch_operands = 2 : i64, tpu.core_type = #tpu.core_type<tc>, window_params = [{transform_indices = @transform_0, window_bounds = array<i64: 2, 56, 128>}, {transform_indices = @transform_1, window_bounds = array<i64: 512, 256>}, {transform_indices = @transform_2, window_bounds = array<i64: 128, 128>}, {transform_indices = @transform_3, window_bounds = array<i64: 96, 128>}]} {
    %c0_i32 = arith.constant 0 : i32
    %0 = arith.cmpi eq, %arg1, %c0_i32 : i32
    %1 = arith.extui %0 : i1 to i32
    %c0_i32_0 = arith.constant 0 : i32
    %2 = arith.cmpi ne, %1, %c0_i32_0 : i32
    scf.if %2 {
      %c0_13 = arith.constant 0 : index
      %c0_14 = arith.constant 0 : index
      %c0_15 = arith.constant 0 : index
      %23 = vector.load %arg2[%c0_13, %c0_14, %c0_15] : memref<2x56x128xf32, #tpu.memory_space<vmem>>, vector<1x48x128xf32>
      %24 = vector.shape_cast %23 : vector<1x48x128xf32> to vector<48x128xf32>
      %25 = arith.truncf %24 : vector<48x128xf32> to vector<48x128xbf16>
      %c0_16 = arith.constant 0 : index
      %c0_17 = arith.constant 0 : index
      %26 = vector.load %arg6[%c0_16, %c0_17] : memref<96x512xbf16, #tpu.memory_space<vmem>>, vector<48x128xbf16>
      tpu.vector_store %arg6[%c0_16, %c0_17], %25 {strides = array<i32>} : memref<96x512xbf16, #tpu.memory_space<vmem>>, vector<48x128xbf16>,
      %c0_18 = arith.constant 0 : index
      %c1 = arith.constant 1 : index
      %c0_19 = arith.constant 0 : index
      %27 = vector.load %arg2[%c0_18, %c1, %c0_19] : memref<2x56x128xf32, #tpu.memory_space<vmem>>, vector<1x48x128xf32>
      %28 = vector.shape_cast %27 : vector<1x48x128xf32> to vector<48x128xf32>
      %29 = arith.truncf %28 : vector<48x128xf32> to vector<48x128xbf16>
      %c0_20 = arith.constant 0 : index
      %c128 = arith.constant 128 : index
      %30 = vector.load %arg6[%c0_20, %c128] : memref<96x512xbf16, #tpu.memory_space<vmem>>, vector<48x128xbf16>
      tpu.vector_store %arg6[%c0_20, %c128], %29 {strides = array<i32>} : memref<96x512xbf16, #tpu.memory_space<vmem>>, vector<48x128xbf16>,
      %c0_21 = arith.constant 0 : index
      %c2 = arith.constant 2 : index
      %c0_22 = arith.constant 0 : index
      %31 = vector.load %arg2[%c0_21, %c2, %c0_22] : memref<2x56x128xf32, #tpu.memory_space<vmem>>, vector<1x48x128xf32>
      %32 = vector.shape_cast %31 : vector<1x48x128xf32> to vector<48x128xf32>
      %33 = arith.truncf %32 : vector<48x128xf32> to vector<48x128xbf16>
      %c0_23 = arith.constant 0 : index
      %c256 = arith.constant 256 : index
      %34 = vector.load %arg6[%c0_23, %c256] : memref<96x512xbf16, #tpu.memory_space<vmem>>, vector<48x128xbf16>
      tpu.vector_store %arg6[%c0_23, %c256], %33 {strides = array<i32>} : memref<96x512xbf16, #tpu.memory_space<vmem>>, vector<48x128xbf16>,
      %c0_24 = arith.constant 0 : index
      %c3 = arith.constant 3 : index
      %c0_25 = arith.constant 0 : index
      %35 = vector.load %arg2[%c0_24, %c3, %c0_25] : memref<2x56x128xf32, #tpu.memory_space<vmem>>, vector<1x48x128xf32>
      %36 = vector.shape_cast %35 : vector<1x48x128xf32> to vector<48x128xf32>
      %37 = arith.truncf %36 : vector<48x128xf32> to vector<48x128xbf16>
      %c0_26 = arith.constant 0 : index
      %c384 = arith.constant 384 : index
      %38 = vector.load %arg6[%c0_26, %c384] : memref<96x512xbf16, #tpu.memory_space<vmem>>, vector<48x128xbf16>
      tpu.vector_store %arg6[%c0_26, %c384], %37 {strides = array<i32>} : memref<96x512xbf16, #tpu.memory_space<vmem>>, vector<48x128xbf16>,
      %c1_27 = arith.constant 1 : index
      %c0_28 = arith.constant 0 : index
      %c0_29 = arith.constant 0 : index
      %39 = vector.load %arg2[%c1_27, %c0_28, %c0_29] : memref<2x56x128xf32, #tpu.memory_space<vmem>>, vector<1x48x128xf32>
      %40 = vector.shape_cast %39 : vector<1x48x128xf32> to vector<48x128xf32>
      %41 = arith.truncf %40 : vector<48x128xf32> to vector<48x128xbf16>
      %c48 = arith.constant 48 : index
      %c0_30 = arith.constant 0 : index
      %42 = vector.load %arg6[%c48, %c0_30] : memref<96x512xbf16, #tpu.memory_space<vmem>>, vector<48x128xbf16>
      tpu.vector_store %arg6[%c48, %c0_30], %41 {strides = array<i32>} : memref<96x512xbf16, #tpu.memory_space<vmem>>, vector<48x128xbf16>,
      %c1_31 = arith.constant 1 : index
      %c1_32 = arith.constant 1 : index
      %c0_33 = arith.constant 0 : index
      %43 = vector.load %arg2[%c1_31, %c1_32, %c0_33] : memref<2x56x128xf32, #tpu.memory_space<vmem>>, vector<1x48x128xf32>
      %44 = vector.shape_cast %43 : vector<1x48x128xf32> to vector<48x128xf32>
      %45 = arith.truncf %44 : vector<48x128xf32> to vector<48x128xbf16>
      %c48_34 = arith.constant 48 : index
      %c128_35 = arith.constant 128 : index
      %46 = vector.load %arg6[%c48_34, %c128_35] : memref<96x512xbf16, #tpu.memory_space<vmem>>, vector<48x128xbf16>
      tpu.vector_store %arg6[%c48_34, %c128_35], %45 {strides = array<i32>} : memref<96x512xbf16, #tpu.memory_space<vmem>>, vector<48x128xbf16>,
      %c1_36 = arith.constant 1 : index
      %c2_37 = arith.constant 2 : index
      %c0_38 = arith.constant 0 : index
      %47 = vector.load %arg2[%c1_36, %c2_37, %c0_38] : memref<2x56x128xf32, #tpu.memory_space<vmem>>, vector<1x48x128xf32>
      %48 = vector.shape_cast %47 : vector<1x48x128xf32> to vector<48x128xf32>
      %49 = arith.truncf %48 : vector<48x128xf32> to vector<48x128xbf16>
      %c48_39 = arith.constant 48 : index
      %c256_40 = arith.constant 256 : index
      %50 = vector.load %arg6[%c48_39, %c256_40] : memref<96x512xbf16, #tpu.memory_space<vmem>>, vector<48x128xbf16>
      tpu.vector_store %arg6[%c48_39, %c256_40], %49 {strides = array<i32>} : memref<96x512xbf16, #tpu.memory_space<vmem>>, vector<48x128xbf16>,
      %c1_41 = arith.constant 1 : index
      %c3_42 = arith.constant 3 : index
      %c0_43 = arith.constant 0 : index
      %51 = vector.load %arg2[%c1_41, %c3_42, %c0_43] : memref<2x56x128xf32, #tpu.memory_space<vmem>>, vector<1x48x128xf32>
      %52 = vector.shape_cast %51 : vector<1x48x128xf32> to vector<48x128xf32>
      %53 = arith.truncf %52 : vector<48x128xf32> to vector<48x128xbf16>
      %c48_44 = arith.constant 48 : index
      %c384_45 = arith.constant 384 : index
      %54 = vector.load %arg6[%c48_44, %c384_45] : memref<96x512xbf16, #tpu.memory_space<vmem>>, vector<48x128xbf16>
      tpu.vector_store %arg6[%c48_44, %c384_45], %53 {strides = array<i32>} : memref<96x512xbf16, #tpu.memory_space<vmem>>, vector<48x128xbf16>,
    } else {
    }
    %c0 = arith.constant 0 : index
    %c0_1 = arith.constant 0 : index
    %3 = vector.load %arg6[%c0, %c0_1] : memref<96x512xbf16, #tpu.memory_space<vmem>>, vector<96x512xbf16>
    %c0_2 = arith.constant 0 : index
    %c0_3 = arith.constant 0 : index
    %4 = vector.load %arg3[%c0_2, %c0_3] : memref<512x256xbf16, #tpu.memory_space<vmem>>, vector<512x256xbf16>
    %cst = arith.constant dense<0.000000e+00> : vector<96x256xf32>
    %5 = tpu.matmul %3, %4, %cst {dimension_numbers = #tpu.dot_dimension_numbers<[1], [0], [0], [1], [0, 0, 1, 1], [], []>} : vector<96x512xbf16>, vector<512x256xbf16>, vector<96x256xf32> -> vector<96x256xf32>
    %6 = vector.extract_strided_slice %5 {offsets = [0, 0], sizes = [96, 128], strides = [1, 1]} : vector<96x256xf32> to vector<96x128xf32>
    %7 = vector.extract_strided_slice %5 {offsets = [0, 128], sizes = [96, 128], strides = [1, 1]} : vector<96x256xf32> to vector<96x128xf32>
    %8 = arith.mulf %6, %6 : vector<96x128xf32>
    %9 = arith.mulf %7, %7 : vector<96x128xf32>
    %10 = arith.addf %8, %9 : vector<96x128xf32>
    %11 = arith.truncf %10 : vector<96x128xf32> to vector<96x128xbf16>
    %c0_4 = arith.constant 0 : index
    %c0_5 = arith.constant 0 : index
    %12 = vector.load %arg4[%c0_4, %c0_5] : memref<128x128xbf16, #tpu.memory_space<vmem>>, vector<128x128xbf16>
    %cst_6 = arith.constant dense<0.000000e+00> : vector<96x128xf32>
    %13 = tpu.matmul %11, %12, %cst_6 {dimension_numbers = #tpu.dot_dimension_numbers<[1], [0], [0], [1], [0, 0, 1, 1], [], []>} : vector<96x128xbf16>, vector<128x128xbf16>, vector<96x128xf32> -> vector<96x128xf32>
    %c0_i32_7 = arith.constant 0 : i32
    %14 = arith.cmpi eq, %arg1, %c0_i32_7 : i32
    %15 = arith.extui %14 : i1 to i32
    %c0_i32_8 = arith.constant 0 : i32
    %16 = arith.cmpi ne, %15, %c0_i32_8 : i32
    scf.if %16 {
      %c0_13 = arith.constant 0 : index
      %c0_14 = arith.constant 0 : index
      %23 = vector.load %arg7[%c0_13, %c0_14] : memref<96x128xf32, #tpu.memory_space<vmem>>, vector<96x128xf32>
      tpu.vector_store %arg7[%c0_13, %c0_14], %13 {strides = array<i32>} : memref<96x128xf32, #tpu.memory_space<vmem>>, vector<96x128xf32>,
    } else {
    }
    %c0_i32_9 = arith.constant 0 : i32
    %17 = arith.cmpi sgt, %arg1, %c0_i32_9 : i32
    %18 = arith.extui %17 : i1 to i32
    %c0_i32_10 = arith.constant 0 : i32
    %19 = arith.cmpi ne, %18, %c0_i32_10 : i32
    scf.if %19 {
      %c0_13 = arith.constant 0 : index
      %c0_14 = arith.constant 0 : index
      %23 = vector.load %arg7[%c0_13, %c0_14] : memref<96x128xf32, #tpu.memory_space<vmem>>, vector<96x128xf32>
      %24 = arith.addf %23, %13 : vector<96x128xf32>
      %c0_15 = arith.constant 0 : index
      %c0_16 = arith.constant 0 : index
      %25 = vector.load %arg7[%c0_15, %c0_16] : memref<96x128xf32, #tpu.memory_space<vmem>>, vector<96x128xf32>
      tpu.vector_store %arg7[%c0_15, %c0_16], %24 {strides = array<i32>} : memref<96x128xf32, #tpu.memory_space<vmem>>, vector<96x128xf32>,
    } else {
    }
    %c0_i32_11 = arith.constant 0 : i32
    %20 = arith.cmpi eq, %arg1, %c0_i32_11 : i32
    %21 = arith.extui %20 : i1 to i32
    %c0_i32_12 = arith.constant 0 : i32
    %22 = arith.cmpi ne, %21, %c0_i32_12 : i32
    scf.if %22 {
      %c0_13 = arith.constant 0 : index
      %c0_14 = arith.constant 0 : index
      %23 = vector.load %arg7[%c0_13, %c0_14] : memref<96x128xf32, #tpu.memory_space<vmem>>, vector<96x128xf32>
      %cst_15 = arith.constant 9.99999974E-6 : f32
      %24 = vector.broadcast %cst_15 : f32 to vector<96x128xf32>
      %25 = arith.addf %23, %24 : vector<96x128xf32>
      %26 = math.log %25 : vector<96x128xf32>
      %c0_16 = arith.constant 0 : index
      %c0_17 = arith.constant 0 : index
      %27 = vector.load %arg5[%c0_16, %c0_17] : memref<96x128xf32, #tpu.memory_space<vmem>>, vector<96x128xf32>
      tpu.vector_store %arg5[%c0_16, %c0_17], %26 {strides = array<i32>} : memref<96x128xf32, #tpu.memory_space<vmem>>, vector<96x128xf32>,
    } else {
    }
    return
  }
  func.func @transform_0(%arg0: i32, %arg1: i32) -> (i32, i32, i32) {
    %c0_i32 = arith.constant 0 : i32
    %c0_i32_0 = arith.constant 0 : i32
    %c0_i32_1 = arith.constant 0 : i32
    return %arg0, %c0_i32, %c0_i32_0 : i32, i32, i32
  }
  func.func @transform_1(%arg0: i32, %arg1: i32) -> (i32, i32) {
    %c0_i32 = arith.constant 0 : i32
    %c0_i32_0 = arith.constant 0 : i32
    return %c0_i32, %arg1 : i32, i32
  }
  func.func @transform_2(%arg0: i32, %arg1: i32) -> (i32, i32) {
    %c0_i32 = arith.constant 0 : i32
    %c0_i32_0 = arith.constant 0 : i32
    return %arg1, %c0_i32 : i32, i32
  }
  func.func @transform_3(%arg0: i32, %arg1: i32) -> (i32, i32) {
    %c0_i32 = arith.constant 0 : i32
    %c0_i32_0 = arith.constant 0 : i32
    return %arg0, %c0_i32 : i32, i32
  }
}

</mosaic_0001>

<bundles_post_ra>
// kernel: tpu_custom_call.1
= control target key start
LH: loop header
LB: loop body
LE: loop exit
PB: predicated region body
PF: predicated region fallthrough
CT: control target
= control target key end

     0   :  { %8 = vsyncpa [#allocation5], 0  ;;  %s1551_s0 = inlined_call_operand.hbm [shape: f32[2,56,128], index: 0, kind: input, shape index: {}]   ;;  %s1552_s1 = inlined_call_operand.hbm [shape: bf16[512,256], index: 1, kind: input, shape index: {}]   ;;  %s1553_s2 = inlined_call_operand.hbm [shape: bf16[128,128], index: 2, kind: input, shape index: {}]   ;;  %s1554_s3 = inlined_call_operand.hbm [shape: f32[96,128], index: 3, kind: output, shape index: {}]  }
   0x1   :  { %9 = vsyncpa [#allocation8], 0 }
   0x2   :  { %10 = vsyncpa [#allocation6], 0  ;;  %s1459_s12 = smov [#allocation7]   ;;  %s1460_s14 = smov [#allocation4]  }
   0x3   :  { %s28_s13 = sshll.u32 %s1459_s12, 4  ;;  %s16_s15 = sshll.u32 %s1460_s14, 4  ;;  %s29_s13 = int_to_ptr.vmem [resolvable:$true] %s28_s13  ;;  %s1487_s15 = int_to_ptr.vmem [resolvable:$true] %s16_s15 }
   0x4   :  { %s1365_s18 = scalar_lea.hbm %s1552_s1, 8192 }
   0x5   :  { %p1366_p0 = scmp.ne.s32.totalorder %s1552_s1, %s1365_s18  ;;  %p1369_p1 = scmp.lt.u32.totalorder %s1365_s18, %s1552_s1 }
   0x7   :  { %p1371_p2 = pnand %p1369_p1, %p1366_p0 }
   0x9   :  { %1374 = shalt.err (!%p1371_p2)
}
   0xa   :  { %s1375_s23 = scalar_lea.vmem %s29_s13, 8192  ;;  %p1380_p4 = scmp.lt.s32.totalorder %s29_s13, %s29_s13 }
   0xb   :  { %p1376_p3 = scmp.ne.s32.totalorder %s29_s13, %s1375_s23  ;;  %p1381_p5 = scmp.lt.s32.totalorder %s1375_s23, %s1375_s23 }
   0xd   :  { %p1382_p6 = por %p1381_p5, %p1380_p4 }
   0xf   :  { %p1383_p7 = pnand %p1382_p6, %p1376_p3 }
  0x11   :  { %1386 = shalt.err (!%p1383_p7)
}
  0x12   :  { %s1461_s24 = smov 128   ;;  %s1462_s25 = smov 8  }
  0x13   :  { %34 = dma.hbm_to_vmem [thread:$0]  %s1552_s1, 8192, %s29_s13, [#allocation8], %s1461_s24, %s1461_s24, %s1462_s25  }
  0x14   :  { %s1387_s30 = scalar_lea.hbm %s1551_s0, 1792 }
  0x15   :  { %p1388_p8 = scmp.ne.s32.totalorder %s1551_s0, %s1387_s30  ;;  %p1391_p9 = scmp.lt.u32.totalorder %s1387_s30, %s1551_s0 }
  0x17   :  { %p1393_p10 = pnand %p1391_p9, %p1388_p8 }
  0x19   :  { %1396 = shalt.err (!%p1393_p10)
}
  0x1a   :  { %s1397_s8 = scalar_lea.vmem %s1487_s15, 1792  ;;  %p1402_p12 = scmp.lt.s32.totalorder %s1487_s15, %s1487_s15 }
  0x1b   :  { %p1398_p11 = scmp.ne.s32.totalorder %s1487_s15, %s1397_s8  ;;  %p1403_p13 = scmp.lt.s32.totalorder %s1397_s8, %s1397_s8 }
  0x1d   :  { %p1404_p0 = por %p1403_p13, %p1402_p12 }
  0x1f   :  { %p1405_p1 = pnand %p1404_p0, %p1398_p11 }
  0x21   :  { %1408 = shalt.err (!%p1405_p1)
}
  0x22   :  { %22 = dma.hbm_to_vmem [thread:$0]  %s1551_s0, 1792, %s1487_s15, [#allocation5], %s1461_s24, %s1461_s24, %s1462_s25  }
  0x23   :  { %s1463_s10 = smov [#allocation9]   ;;  %s1409_s14 = scalar_lea.hbm %s1553_s2, 1024 }
  0x24   :  { %s40_s11 = sshll.u32 %s1463_s10, 4  ;;  %p1410_p2 = scmp.ne.s32.totalorder %s1553_s2, %s1409_s14  ;;  %s41_s11 = int_to_ptr.vmem [resolvable:$true] %s40_s11 }
  0x25   :  { %p1413_p3 = scmp.lt.u32.totalorder %s1409_s14, %s1553_s2 }
  0x27   :  { %p1415_p4 = pnand %p1413_p3, %p1410_p2 }
  0x29   :  { %1418 = shalt.err (!%p1415_p4)
}
  0x2a   :  { %s1419_s20 = scalar_lea.vmem %s41_s11, 1024  ;;  %p1424_p6 = scmp.lt.s32.totalorder %s41_s11, %s41_s11 }
  0x2b   :  { %p1420_p5 = scmp.ne.s32.totalorder %s41_s11, %s1419_s20  ;;  %p1425_p7 = scmp.lt.s32.totalorder %s1419_s20, %s1419_s20 }
  0x2d   :  { %p1426_p8 = por %p1425_p7, %p1424_p6 }
  0x2f   :  { %p1427_p9 = pnand %p1426_p8, %p1420_p5 }
  0x31   :  { %1430 = shalt.err (!%p1427_p9)
}
  0x32   :  { %s1464_s0 = smov 64   ;;  %s1465_s15 = smov 4  }
  0x33   :  { %46 = dma.hbm_to_vmem [thread:$0]  %s1553_s2, 1024, %s41_s11, [#allocation8], %s1464_s0, %s1464_s0, %s1465_s15  }
  0x34   :  { %1453 = dma.done.wait [#allocation5], 1792  }
  0x35   :  { %1454 = vsyncadd [#allocation5], 4294965504 }
  0x36   :  { %1455 = dma.done.wait [#allocation8], 9216  }
  0x37   :  { %1456 = vsyncadd [#allocation8], 4294958080  ;;  %v1237_v0 = vld [vmem:[#allocation7 + $0x4] ss:$8 sps:$4 sm:$0xff]   ;;  %v1241_v2 = vld [vmem:[#allocation7] ss:$8 sps:$4 sm:$0xff]  }
  0x38   :  { %v1239_v1 = vld [vmem:[#allocation7 + $0x104] ss:$8 sps:$4 sm:$0xff]   ;;  %566 = vmatprep.subr.bf16.mxu1 %v1237_v0  ;;  %v1242_v3 = vld [vmem:[#allocation7 + $0x100] ss:$8 sps:$4 sm:$0xff]   ;;  %v1243_v4 = vld [vmem:[#allocation7 + $0x14] ss:$8 sps:$4 sm:$0xff]  }
  0x39   :  { %659 = vmatprep.subr.bf16.mxu0 %v1239_v1  ;;  %567 = vmatpush1.bf16.msra.mxu1 %v1241_v2  ;;  %v1245_v5 = vld [vmem:[#allocation7 + $0x114] ss:$8 sps:$4 sm:$0xff]   ;;  %v1247_v6 = vld [vmem:[#allocation7 + $0x10] ss:$8 sps:$4 sm:$0xff]   ;;  %v1249_v8 = vld [vmem:[#allocation7 + $0x24] ss:$8 sps:$4 sm:$0xff]  }
  0x3a   :  { %660 = vmatpush1.bf16.msra.mxu0 %v1242_v3  ;;  %568 = vmatprep.subr.bf16.mxu1 %v1243_v4  ;;  %v1248_v7 = vld [vmem:[#allocation7 + $0x110] ss:$8 sps:$4 sm:$0xff]   ;;  %v1251_v9 = vld [vmem:[#allocation7 + $0x124] ss:$8 sps:$4 sm:$0xff]   ;;  %v1253_v10 = vld [vmem:[#allocation7 + $0x20] ss:$8 sps:$4 sm:$0xff]  }
  0x3b   :  { %661 = vmatprep.subr.bf16.mxu0 %v1245_v5  ;;  %v1254_v11 = vld [vmem:[#allocation7 + $0x120] ss:$8 sps:$4 sm:$0xff]   ;;  %v1255_v12 = vld [vmem:[#allocation7 + $0x34] ss:$8 sps:$4 sm:$0xff]   ;;  %v1259_v14 = vld [vmem:[#allocation7 + $0x30] ss:$8 sps:$4 sm:$0xff]  }
  0x3c   :  { %v1257_v13 = vld [vmem:[#allocation7 + $0x134] ss:$8 sps:$4 sm:$0xff]   ;;  %v1260_v15 = vld [vmem:[#allocation7 + $0x130] ss:$8 sps:$4 sm:$0xff]   ;;  %v1261_v16 = vld [vmem:[#allocation7 + $0x44] ss:$8 sps:$4 sm:$0xff]  }
  0x3d   :  { %569 = vmatpush1.bf16.msra.mxu1 %v1247_v6  ;;  %v1263_v17 = vld [vmem:[#allocation7 + $0x144] ss:$8 sps:$4 sm:$0xff]   ;;  %v1265_v18 = vld [vmem:[#allocation7 + $0x40] ss:$8 sps:$4 sm:$0xff]   ;;  %v1267_v20 = vld [vmem:[#allocation7 + $0x54] ss:$8 sps:$4 sm:$0xff]  }
  0x3e   :  { %662 = vmatpush1.bf16.msra.mxu0 %v1248_v7  ;;  %570 = vmatprep.subr.bf16.mxu1 %v1249_v8  ;;  %v1266_v19 = vld [vmem:[#allocation7 + $0x140] ss:$8 sps:$4 sm:$0xff]   ;;  %v1269_v21 = vld [vmem:[#allocation7 + $0x154] ss:$8 sps:$4 sm:$0xff]   ;;  %v1271_v22 = vld [vmem:[#allocation7 + $0x50] ss:$8 sps:$4 sm:$0xff]  }
  0x3f   :  { %663 = vmatprep.subr.bf16.mxu0 %v1251_v9  ;;  %v1272_v23 = vld [vmem:[#allocation7 + $0x150] ss:$8 sps:$4 sm:$0xff]   ;;  %v1273_v24 = vld [vmem:[#allocation7 + $0x64] ss:$8 sps:$4 sm:$0xff]   ;;  %v1277_v26 = vld [vmem:[#allocation7 + $0x60] ss:$8 sps:$4 sm:$0xff]  }
  0x40   :  { %v1275_v25 = vld [vmem:[#allocation7 + $0x164] ss:$8 sps:$4 sm:$0xff]   ;;  %v1278_v27 = vld [vmem:[#allocation7 + $0x160] ss:$8 sps:$4 sm:$0xff]   ;;  %v1279_v28 = vld [vmem:[#allocation7 + $0x74] ss:$8 sps:$4 sm:$0xff]  }
  0x41   :  { %571 = vmatpush1.bf16.msra.mxu1 %v1253_v10  ;;  %v1281_v29 = vld [vmem:[#allocation7 + $0x174] ss:$8 sps:$4 sm:$0xff]   ;;  %v1283_v30 = vld [vmem:[#allocation7 + $0x70] ss:$8 sps:$4 sm:$0xff]   ;;  %v1285_v32 = vld [vmem:[#allocation7 + $0x84] ss:$8 sps:$4 sm:$0xff]  }
  0x42   :  { %664 = vmatpush1.bf16.msra.mxu0 %v1254_v11  ;;  %572 = vmatprep.subr.bf16.mxu1 %v1255_v12  ;;  %v1284_v31 = vld [vmem:[#allocation7 + $0x170] ss:$8 sps:$4 sm:$0xff]   ;;  %v1287_v33 = vld [vmem:[#allocation7 + $0x184] ss:$8 sps:$4 sm:$0xff]   ;;  %v1289_v34 = vld [vmem:[#allocation7 + $0x80] ss:$8 sps:$4 sm:$0xff]  }
  0x43   :  { %665 = vmatprep.subr.bf16.mxu0 %v1257_v13  ;;  %v1290_v35 = vld [vmem:[#allocation7 + $0x180] ss:$8 sps:$4 sm:$0xff]   ;;  %v1291_v36 = vld [vmem:[#allocation7 + $0x94] ss:$8 sps:$4 sm:$0xff]   ;;  %v1295_v38 = vld [vmem:[#allocation7 + $0x90] ss:$8 sps:$4 sm:$0xff]  }
  0x44   :  { %v1293_v37 = vld [vmem:[#allocation7 + $0x194] ss:$8 sps:$4 sm:$0xff]   ;;  %v1296_v39 = vld [vmem:[#allocation7 + $0x190] ss:$8 sps:$4 sm:$0xff]   ;;  %v1297_v40 = vld [vmem:[#allocation7 + $0xa4] ss:$8 sps:$4 sm:$0xff]  }
  0x45   :  { %573 = vmatpush1.bf16.msra.mxu1 %v1259_v14  ;;  %v1299_v41 = vld [vmem:[#allocation7 + $0x1a4] ss:$8 sps:$4 sm:$0xff]   ;;  %v1301_v42 = vld [vmem:[#allocation7 + $0xa0] ss:$8 sps:$4 sm:$0xff]   ;;  %v1303_v44 = vld [vmem:[#allocation7 + $0xb4] ss:$8 sps:$4 sm:$0xff]  }
  0x46   :  { %666 = vmatpush1.bf16.msra.mxu0 %v1260_v15  ;;  %574 = vmatprep.subr.bf16.mxu1 %v1261_v16  ;;  %v1302_v43 = vld [vmem:[#allocation7 + $0x1a0] ss:$8 sps:$4 sm:$0xff]   ;;  %v1305_v45 = vld [vmem:[#allocation7 + $0x1b4] ss:$8 sps:$4 sm:$0xff]   ;;  %v1307_v50 = vld [vmem:[#allocation7 + $0xb0] ss:$8 sps:$4 sm:$0xff]  }
  0x47   :  { %667 = vmatprep.subr.bf16.mxu0 %v1263_v17  ;;  %v73_v46 = vld [vmem:[#allocation4 + $0x1] sm:$0xff]  ;;  %v74_v47 = vld [vmem:[#allocation4 + $0x9] sm:$0xff]  ;;  %v1309_v54 = vld [vmem:[#allocation7 + $0xc4] ss:$8 sps:$4 sm:$0xff]   ;;  %s1466_s2 = smov [#allocation10]  }
  0x48   :  { %v97_v48 = vld [vmem:[#allocation4 + $0x3] sm:$0xff]  ;;  %v98_v49 = vld [vmem:[#allocation4 + $0xb] sm:$0xff]  ;;  %v79_v52 = vpack.c.bf16 %v74_v47, %v73_v46  ;;  %v1311_v55 = vld [vmem:[#allocation7 + $0x1c4] ss:$8 sps:$4 sm:$0xff]   ;;  %s1062_s23 = sshll.u32 %s1466_s2, 4  ;;  %s1063_s23 = int_to_ptr.vmem [resolvable:$true] %s1062_s23 }
  0x49   :  { %575 = vmatpush1.bf16.msra.mxu1 %v1265_v18  ;;  %v1308_v51 = vld [vmem:[#allocation7 + $0x1b0] ss:$8 sps:$4 sm:$0xff]   ;;  %v103_v53 = vpack.c.bf16 %v98_v49, %v97_v48  ;;  %v1313_v56 = vld [vmem:[#allocation7 + $0xc0] ss:$8 sps:$4 sm:$0xff]   ;;  %v1315_v58 = vld [vmem:[#allocation7 + $0xd4] ss:$8 sps:$4 sm:$0xff]   ;;  %p1436_p11 = scmp.lt.s32.totalorder %s1063_s23, %s1063_s23 }
  0x4a   :  { %668 = vmatpush1.bf16.msra.mxu0 %v1266_v19  ;;  %576 = vmatprep.subr.bf16.mxu1 %v1267_v20  ;;  %v1314_v57 = vld [vmem:[#allocation7 + $0x1c0] ss:$8 sps:$4 sm:$0xff]   ;;  %v1317_v59 = vld [vmem:[#allocation7 + $0x1d4] ss:$8 sps:$4 sm:$0xff]   ;;  %v1319_v60 = vld [vmem:[#allocation7 + $0xd0] ss:$8 sps:$4 sm:$0xff]  }
  0x4b   :  { %669 = vmatprep.subr.bf16.mxu0 %v1269_v21  ;;  %598 = vmatprep.mubr.bf16.mxu1 %v79_v52  ;;  %v1320_v61 = vld [vmem:[#allocation7 + $0x1d0] ss:$8 sps:$4 sm:$0xff]   ;;  %v1321_v62 = vld [vmem:[#allocation7 + $0xe4] ss:$8 sps:$4 sm:$0xff]   ;;  %v1325_v0 = vld [vmem:[#allocation7 + $0xe0] ss:$8 sps:$4 sm:$0xff]  }
  0x4c   :  { %691 = vmatprep.mubr.bf16.mxu0 %v103_v53  ;;  %v1323_v63 = vld [vmem:[#allocation7 + $0x1e4] ss:$8 sps:$4 sm:$0xff]   ;;  %v1326_v1 = vld [vmem:[#allocation7 + $0x1e0] ss:$8 sps:$4 sm:$0xff]   ;;  %v1327_v2 = vld [vmem:[#allocation7 + $0xf4] ss:$8 sps:$4 sm:$0xff]  }
  0x4d   :  { %577 = vmatpush1.bf16.msra.mxu1 %v1271_v22  ;;  %v1329_v3 = vld [vmem:[#allocation7 + $0x1f4] ss:$8 sps:$4 sm:$0xff]   ;;  %v1331_v4 = vld [vmem:[#allocation7 + $0xf0] ss:$8 sps:$4 sm:$0xff]   ;;  %v75_v10 = vld [vmem:[#allocation4 + $0x11] sm:$0xff]  ;;  %s1431_s26 = scalar_lea.vmem %s1063_s23, 1536 }
  0x4e   :  { %670 = vmatpush1.bf16.msra.mxu0 %v1272_v23  ;;  %578 = vmatprep.subr.bf16.mxu1 %v1273_v24  ;;  %v1332_v5 = vld [vmem:[#allocation7 + $0x1f0] ss:$8 sps:$4 sm:$0xff]   ;;  %v99_v12 = vld [vmem:[#allocation4 + $0x13] sm:$0xff]  ;;  %p1432_p10 = scmp.ne.s32.totalorder %s1063_s23, %s1431_s26  ;;  %p1437_p12 = scmp.lt.s32.totalorder %s1431_s26, %s1431_s26 }
  0x4f   :  { %671 = vmatprep.subr.bf16.mxu0 %v1275_v25  ;;  %v61_v6 = vld [vmem:[#allocation4] sm:$0xff]  ;;  %v62_v7 = vld [vmem:[#allocation4 + $0x8] sm:$0xff]  ;;  %v1333_v14 = vld [vmem:[#allocation9] sm:$0xff]  }
  0x50   :  { %v85_v8 = vld [vmem:[#allocation4 + $0x2] sm:$0xff]  ;;  %v86_v9 = vld [vmem:[#allocation4 + $0xa] sm:$0xff]  ;;  %v76_v11 = vld [vmem:[#allocation4 + $0x19] sm:$0xff]  ;;  %v67_v15 = vpack.c.bf16 %v62_v7, %v61_v6  ;;  %p1438_p13 = por %p1437_p12, %p1436_p11 }
  0x51   :  { %579 = vmatpush1.bf16.msra.mxu1 %v1277_v26  ;;  %v100_v13 = vld [vmem:[#allocation4 + $0x1b] sm:$0xff]  ;;  %v91_v16 = vpack.c.bf16 %v86_v9, %v85_v8  ;;  %v80_v17 = vpack.c.bf16 %v76_v11, %v75_v10  ;;  %v63_v20 = vld [vmem:[#allocation4 + $0x10] sm:$0xff]  ;;  %v101_v26 = vld [vmem:[#allocation4 + $0x23] sm:$0xff] }
  0x52   :  { %672 = vmatpush1.bf16.msra.mxu0 %v1278_v27  ;;  %580 = vmatprep.subr.bf16.mxu1 %v1279_v28  ;;  %v104_v18 = vpack.c.bf16 %v100_v13, %v99_v12  ;;  %v1334_v19 = vld [vmem:[#allocation9 + $0x8] sm:$0xff]   ;;  %v77_v24 = vld [vmem:[#allocation4 + $0x21] sm:$0xff]  ;;  %v78_v25 = vld [vmem:[#allocation4 + $0x29] sm:$0xff]  ;;  %p1439_p0 = pnand %p1438_p13, %p1432_p10 }
  0x53   :  { %673 = vmatprep.subr.bf16.mxu0 %v1281_v29  ;;  %v64_v21 = vld [vmem:[#allocation4 + $0x18] sm:$0xff]  ;;  %v102_v27 = vld [vmem:[#allocation4 + $0x2b] sm:$0xff]  ;;  %v1335_v28 = vld [vmem:[#allocation9 + $0x10] sm:$0xff]  }
  0x54   :  { %v87_v22 = vld [vmem:[#allocation4 + $0x12] sm:$0xff]  ;;  %v88_v23 = vld [vmem:[#allocation4 + $0x1a] sm:$0xff]  ;;  %v68_v29 = vpack.c.bf16 %v64_v21, %v63_v20  ;;  %v135_v48 = vld [vmem:[#allocation4 + $0x42] sm:$0xff] }
  0x55   :  { %581 = vmatpush1.bf16.msra.mxu1 %v1283_v30  ;;  %v92_v30 = vpack.c.bf16 %v88_v23, %v87_v22  ;;  %v111_v46 = vld [vmem:[#allocation4 + $0x40] sm:$0xff]  ;;  %v124_v49 = vld [vmem:[#allocation4 + $0x49] sm:$0xff]  ;;  %v149_v52 = vld [vmem:[#allocation4 + $0x53] sm:$0xff] }
  0x56   :  { %674 = vmatpush1.bf16.msra.mxu0 %v1284_v31  ;;  %582 = vmatprep.subr.bf16.mxu1 %v1285_v32  ;;  %v81_v31 = vpack.c.bf16 %v78_v25, %v77_v24  ;;  %v105_v32 = vpack.c.bf16 %v102_v27, %v101_v26  ;;  %v134_v47 = vld [vmem:[#allocation4 + $0x3a] sm:$0xff]  ;;  %v139_v8 = vld [vmem:[#allocation4 + $0x62] sm:$0xff]  ;;  %v1337_v12 = vld [vmem:[#allocation9 + $0x20] sm:$0xff]  }
  0x57   :  { %675 = vmatprep.subr.bf16.mxu0 %v1287_v33  ;;  %v65_v33 = vld [vmem:[#allocation4 + $0x20] sm:$0xff]  ;;  %v1336_v11 = vld [vmem:[#allocation9 + $0x18] sm:$0xff]   ;;  %v1338_v13 = vld [vmem:[#allocation9 + $0x28] sm:$0xff]  }
  0x58   :  { %v115_v6 = vld [vmem:[#allocation4 + $0x60] sm:$0xff] }
  0x59   :  { %583 = vmatpush1.bf16.msra.mxu1 %v1289_v34  ;;  %v66_v34 = vld [vmem:[#allocation4 + $0x28] sm:$0xff]  ;;  %v138_v7 = vld [vmem:[#allocation4 + $0x5a] sm:$0xff] }
  0x5a   :  { %676 = vmatpush1.bf16.msra.mxu0 %v1290_v35  ;;  %584 = vmatprep.subr.bf16.mxu1 %v1291_v36  ;;  %v89_v35 = vld [vmem:[#allocation4 + $0x22] sm:$0xff]  ;;  %v90_v36 = vld [vmem:[#allocation4 + $0x2a] sm:$0xff]  ;;  %v142_v10 = vpack.c.bf16 %v139_v8, %v138_v7 }
  0x5b   :  { %677 = vmatprep.subr.bf16.mxu0 %v1293_v37  ;;  %v122_v37 = vld [vmem:[#allocation4 + $0x39] sm:$0xff] }
  0x5d   :  { %585 = vmatpush1.bf16.msra.mxu1 %v1295_v38  ;;  %v123_v38 = vld [vmem:[#allocation4 + $0x41] sm:$0xff] }
  0x5e   :  { %678 = vmatpush1.bf16.msra.mxu0 %v1296_v39  ;;  %586 = vmatprep.subr.bf16.mxu1 %v1297_v40  ;;  %v146_v39 = vld [vmem:[#allocation4 + $0x3b] sm:$0xff]  ;;  %v147_v40 = vld [vmem:[#allocation4 + $0x43] sm:$0xff] }
  0x5f   :  { %679 = vmatprep.subr.bf16.mxu0 %v1299_v41  ;;  %v69_v41 = vpack.c.bf16 %v66_v34, %v65_v33 }
  0x61   :  { %587 = vmatpush1.bf16.msra.mxu1 %v1301_v42  ;;  %v93_v42 = vpack.c.bf16 %v90_v36, %v89_v35 }
  0x62   :  { %680 = vmatpush1.bf16.msra.mxu0 %v1302_v43  ;;  %588 = vmatprep.subr.bf16.mxu1 %v1303_v44  ;;  %v128_v43 = vpack.c.bf16 %v123_v38, %v122_v37  ;;  %v152_v44 = vpack.c.bf16 %v147_v40, %v146_v39 }
  0x63   :  { %681 = vmatprep.subr.bf16.mxu0 %v1305_v45  ;;  %v110_v45 = vld [vmem:[#allocation4 + $0x38] sm:$0xff] }
  0x64   :  { %v116_v53 = vpack.c.bf16 %v111_v46, %v110_v45 }
  0x65   :  { %589 = vmatpush1.bf16.msra.mxu1 %v1307_v50  ;;  %v125_v50 = vld [vmem:[#allocation4 + $0x51] sm:$0xff] }
  0x66   :  { %682 = vmatpush1.bf16.msra.mxu0 %v1308_v51  ;;  %590 = vmatprep.subr.bf16.mxu1 %v1309_v54  ;;  %v148_v51 = vld [vmem:[#allocation4 + $0x4b] sm:$0xff]  ;;  %v140_v54 = vpack.c.bf16 %v135_v48, %v134_v47 }
  0x67   :  { %683 = vmatprep.subr.bf16.mxu0 %v1311_v55  ;;  %v129_v55 = vpack.c.bf16 %v125_v50, %v124_v49 }
  0x69   :  { %591 = vmatpush1.bf16.msra.mxu1 %v1313_v56  ;;  %v153_v56 = vpack.c.bf16 %v149_v52, %v148_v51 }
  0x6a   :  { %684 = vmatpush1.bf16.msra.mxu0 %v1314_v57  ;;  %592 = vmatprep.subr.bf16.mxu1 %v1315_v58  ;;  %v112_v57 = vld [vmem:[#allocation4 + $0x48] sm:$0xff]  ;;  %v113_v58 = vld [vmem:[#allocation4 + $0x50] sm:$0xff] }
  0x6b   :  { %685 = vmatprep.subr.bf16.mxu0 %v1317_v59  ;;  %v136_v59 = vld [vmem:[#allocation4 + $0x4a] sm:$0xff] }
  0x6d   :  { %593 = vmatpush1.bf16.msra.mxu1 %v1319_v60  ;;  %v137_v60 = vld [vmem:[#allocation4 + $0x52] sm:$0xff] }
  0x6e   :  { %686 = vmatpush1.bf16.msra.mxu0 %v1320_v61  ;;  %594 = vmatprep.subr.bf16.mxu1 %v1321_v62  ;;  %v126_v61 = vld [vmem:[#allocation4 + $0x59] sm:$0xff]  ;;  %v127_v62 = vld [vmem:[#allocation4 + $0x61] sm:$0xff] }
  0x6f   :  { %687 = vmatprep.subr.bf16.mxu0 %v1323_v63  ;;  %v150_v63 = vld [vmem:[#allocation4 + $0x5b] sm:$0xff] }
  0x71   :  { %595 = vmatpush1.bf16.msra.mxu1 %v1325_v0  ;;  %v151_v0 = vld [vmem:[#allocation4 + $0x63] sm:$0xff] }
  0x72   :  { %688 = vmatpush1.bf16.msra.mxu0 %v1326_v1  ;;  %596 = vmatprep.subr.bf16.mxu1 %v1327_v2  ;;  %v117_v1 = vpack.c.bf16 %v113_v58, %v112_v57  ;;  %v141_v2 = vpack.c.bf16 %v137_v60, %v136_v59 }
  0x73   :  { %689 = vmatprep.subr.bf16.mxu0 %v1329_v3  ;;  %v130_v3 = vpack.c.bf16 %v127_v62, %v126_v61 }
  0x75   :  { %597 = vmatpush1.bf16.msra.mxu1 %v1331_v4  ;;  %v154_v4 = vpack.c.bf16 %v151_v0, %v150_v63 }
  0x76   :  { %690 = vmatpush1.bf16.msra.mxu0 %v1332_v5  ;;  %1189 = vmatprep.subr.bf16.mxu1 %v1333_v14  ;;  %v114_v5 = vld [vmem:[#allocation4 + $0x58] sm:$0xff] }
  0x77   :  { %1161 = vmatprep.subr.bf16.mxu0 %v1333_v14  ;;  %v118_v9 = vpack.c.bf16 %v115_v6, %v114_v5 }
  0x78   :  { %599 = vmatmul.mubr.bf16.vlgmr.msra.gmra.mrb[0].mxu1 %v67_v15  ;;  %v1340_v15 = vld [vmem:[#allocation9 + $0x38] sm:$0xff]  }
  0x79   :  { %692 = vmatmul.mubr.bf16.vlgmr.msra.gmra.mrb[0].mxu0 %v91_v16  ;;  %608 = vmatprep.mubr.bf16.mxu1 %v80_v17 }
  0x7a   :  { %701 = vmatprep.mubr.bf16.mxu0 %v104_v18  ;;  %1162 = vmatpush3.bf16.msra.mxu0 %v1333_v14 }
  0x7b   :  { %1197 = vmatpush3.bf16.msra.mxu1 %v1333_v14  ;;  %1163 = vmatprep.subr.bf16.mxu0 %v1334_v19  ;;  %v1339_v14 = vld [vmem:[#allocation9 + $0x30] sm:$0xff]  }
  0x7c   :  { %1190 = vmatprep.subr.bf16.mxu1 %v1334_v19 }
  0x7e   :  { %1164 = vmatpush3.bf16.msra.mxu0 %v1334_v19 }
  0x7f   :  { %1198 = vmatpush3.bf16.msra.mxu1 %v1334_v19  ;;  %1165 = vmatprep.subr.bf16.mxu0 %v1335_v28 }
  0x80   :  { %1191 = vmatprep.subr.bf16.mxu1 %v1335_v28  ;;  %609 = vmatmul.mubr.bf16.gmra.mrb[4].mxu1 %v68_v29 }
  0x81   :  { %702 = vmatmul.mubr.bf16.gmra.mrb[4].mxu0 %v92_v30  ;;  %618 = vmatprep.mubr.bf16.mxu1 %v81_v31 }
  0x82   :  { %711 = vmatprep.mubr.bf16.mxu0 %v105_v32  ;;  %1166 = vmatpush3.bf16.msra.mxu0 %v1335_v28 }
  0x83   :  { %1199 = vmatpush3.bf16.msra.mxu1 %v1335_v28  ;;  %1167 = vmatprep.subr.bf16.mxu0 %v1336_v11 }
  0x84   :  { %1192 = vmatprep.subr.bf16.mxu1 %v1336_v11 }
  0x86   :  { %1168 = vmatpush3.bf16.msra.mxu0 %v1336_v11 }
  0x87   :  { %1200 = vmatpush3.bf16.msra.mxu1 %v1336_v11  ;;  %1169 = vmatprep.subr.bf16.mxu0 %v1337_v12 }
  0x88   :  { %619 = vmatmul.mubr.bf16.gmra.mrb[8].mxu1 %v69_v41  ;;  %1193 = vmatprep.subr.bf16.mxu1 %v1337_v12 }
  0x89   :  { %712 = vmatmul.mubr.bf16.gmra.mrb[8].mxu0 %v93_v42  ;;  %628 = vmatprep.mubr.bf16.mxu1 %v128_v43 }
  0x8a   :  { %721 = vmatprep.mubr.bf16.mxu0 %v152_v44  ;;  %1170 = vmatpush3.bf16.msra.mxu0 %v1337_v12 }
  0x8b   :  { %1201 = vmatpush3.bf16.msra.mxu1 %v1337_v12  ;;  %1171 = vmatprep.subr.bf16.mxu0 %v1338_v13 }
  0x8c   :  { %1194 = vmatprep.subr.bf16.mxu1 %v1338_v13 }
  0x8e   :  { %1172 = vmatpush3.bf16.msra.mxu0 %v1338_v13 }
  0x8f   :  { %1202 = vmatpush3.bf16.msra.mxu1 %v1338_v13  ;;  %1173 = vmatprep.subr.bf16.mxu0 %v1339_v14 }
  0x90   :  { %629 = vmatmul.mubr.bf16.gmra.mrb[12].mxu1 %v116_v53  ;;  %1195 = vmatprep.subr.bf16.mxu1 %v1339_v14 }
  0x91   :  { %722 = vmatmul.mubr.bf16.gmra.mrb[12].mxu0 %v140_v54  ;;  %638 = vmatprep.mubr.bf16.mxu1 %v129_v55 }
  0x92   :  { %731 = vmatprep.mubr.bf16.mxu0 %v153_v56  ;;  %1174 = vmatpush3.bf16.msra.mxu0 %v1339_v14 }
  0x93   :  { %1203 = vmatpush3.bf16.msra.mxu1 %v1339_v14  ;;  %1175 = vmatprep.subr.bf16.mxu0 %v1340_v15 }
  0x94   :  { %1196 = vmatprep.subr.bf16.mxu1 %v1340_v15 }
  0x96   :  { %1176 = vmatpush3.bf16.msra.mxu0 %v1340_v15 }
  0x97   :  { %1204 = vmatpush3.bf16.msra.mxu1 %v1340_v15 }
  0x98   :  { %639 = vmatmul.mubr.bf16.gmra.mrb[16].mxu1 %v117_v1 }
  0x99   :  { %732 = vmatmul.mubr.bf16.gmra.mrb[16].mxu0 %v141_v2  ;;  %648 = vmatprep.mubr.bf16.mxu1 %v130_v3 }
  0x9a   :  { %741 = vmatprep.mubr.bf16.mxu0 %v154_v4 }
  0xa0   :  { %649 = vmatmul.mubr.bf16.gmra.mrb[20].mxu1 %v118_v9 }
  0xa1   :  { %742 = vmatmul.mubr.bf16.gmra.mrb[20].mxu0 %v142_v10 }
 0x14b   :  { %v600_v16 = vpop.f32.mrb[0].mxu1 }
 0x14c   :  { %v693_v17 = vpop.f32.mrb[0].mxu0  ;;  %v602_v19 = vpop.f32.mrb[1].mxu1 }
 0x14d   :  { %v694_v18 = vadd.f32 %v693_v17, %v600_v16  ;;  %v695_v20 = vpop.f32.mrb[1].mxu0  ;;  %v604_v22 = vpop.f32.mrb[2].mxu1 }
 0x14e   :  { %v696_v21 = vadd.f32 %v695_v20, %v602_v19  ;;  %v697_v23 = vpop.f32.mrb[2].mxu0  ;;  %v606_v26 = vpop.f32.mrb[3].mxu1 }
 0x14f   :  { %v752_v24 = vmul.f32 %v694_v18, %v694_v18  ;;  %v698_v25 = vadd.f32 %v697_v23, %v604_v22  ;;  %v699_v27 = vpop.f32.mrb[3].mxu0 }
 0x150   :  { %v764_v28 = vmul.f32 %v696_v21, %v696_v21  ;;  %v700_v29 = vadd.f32 %v699_v27, %v606_v26 }
 0x151   :  { %v753_v30 = vmul.f32 %v698_v25, %v698_v25 }
 0x152   :  { %v776_v31 = vadd.f32 %v764_v28, %v752_v24  ;;  %v765_v32 = vmul.f32 %v700_v29, %v700_v29 }
 0x153   :  { %v610_v34 = vpop.f32.mrb[4].mxu1 }
 0x154   :  { %v777_v33 = vadd.f32 %v765_v32, %v753_v30  ;;  %v703_v35 = vpop.f32.mrb[4].mxu0  ;;  %v612_v37 = vpop.f32.mrb[5].mxu1 }
 0x155   :  { %v704_v36 = vadd.f32 %v703_v35, %v610_v34  ;;  %v705_v38 = vpop.f32.mrb[5].mxu0  ;;  %v614_v40 = vpop.f32.mrb[6].mxu1 }
 0x156   :  { %v706_v39 = vadd.f32 %v705_v38, %v612_v37  ;;  %v707_v41 = vpop.f32.mrb[6].mxu0  ;;  %v788_v42 = vpack.c.bf16 %v777_v33, %v776_v31  ;;  %v616_v45 = vpop.f32.mrb[7].mxu1 }
 0x157   :  { %v754_v43 = vmul.f32 %v704_v36, %v704_v36  ;;  %v708_v44 = vadd.f32 %v707_v41, %v614_v40  ;;  %v709_v46 = vpop.f32.mrb[7].mxu0 }
 0x158   :  { %v766_v47 = vmul.f32 %v706_v39, %v706_v39  ;;  %v710_v48 = vadd.f32 %v709_v46, %v616_v45  ;;  %1177 = vmatprep.mubr.bf16.mxu0 %v788_v42 }
 0x159   :  { %v755_v49 = vmul.f32 %v708_v44, %v708_v44 }
 0x15a   :  { %v778_v50 = vadd.f32 %v766_v47, %v754_v43  ;;  %v767_v51 = vmul.f32 %v710_v48, %v710_v48 }
 0x15b   :  { %v620_v53 = vpop.f32.mrb[8].mxu1 }
 0x15c   :  { %v779_v52 = vadd.f32 %v767_v51, %v755_v49  ;;  %v713_v54 = vpop.f32.mrb[8].mxu0  ;;  %v622_v56 = vpop.f32.mrb[9].mxu1 }
 0x15d   :  { %v714_v55 = vadd.f32 %v713_v54, %v620_v53  ;;  %v715_v57 = vpop.f32.mrb[9].mxu0  ;;  %v624_v60 = vpop.f32.mrb[10].mxu1 }
 0x15e   :  { %v789_v58 = vpack.c.bf16 %v779_v52, %v778_v50  ;;  %v716_v59 = vadd.f32 %v715_v57, %v622_v56  ;;  %v717_v61 = vpop.f32.mrb[10].mxu0  ;;  %v626_v0 = vpop.f32.mrb[11].mxu1 }
 0x15f   :  { %v756_v62 = vmul.f32 %v714_v55, %v714_v55  ;;  %v718_v63 = vadd.f32 %v717_v61, %v624_v60  ;;  %v719_v1 = vpop.f32.mrb[11].mxu0 }
 0x160   :  { %v768_v2 = vmul.f32 %v716_v59, %v716_v59  ;;  %v720_v3 = vadd.f32 %v719_v1, %v626_v0  ;;  %1178 = vmatmul.mubr.bf16.vlgmr.msra.gmra.mrb[24].mxu0 %v789_v58 }
 0x161   :  { %v757_v4 = vmul.f32 %v718_v63, %v718_v63 }
 0x162   :  { %v780_v5 = vadd.f32 %v768_v2, %v756_v62  ;;  %v769_v6 = vmul.f32 %v720_v3, %v720_v3 }
 0x163   :  { %v630_v8 = vpop.f32.mrb[12].mxu1 }
 0x164   :  { %v781_v7 = vadd.f32 %v769_v6, %v757_v4  ;;  %v723_v9 = vpop.f32.mrb[12].mxu0  ;;  %v632_v11 = vpop.f32.mrb[13].mxu1 }
 0x165   :  { %v724_v10 = vadd.f32 %v723_v9, %v630_v8  ;;  %v725_v12 = vpop.f32.mrb[13].mxu0  ;;  %v634_v14 = vpop.f32.mrb[14].mxu1 }
 0x166   :  { %v726_v13 = vadd.f32 %v725_v12, %v632_v11  ;;  %v727_v15 = vpop.f32.mrb[14].mxu0  ;;  %v790_v16 = vpack.c.bf16 %v781_v7, %v780_v5  ;;  %v636_v19 = vpop.f32.mrb[15].mxu1 }
 0x167   :  { %v758_v17 = vmul.f32 %v724_v10, %v724_v10  ;;  %v728_v18 = vadd.f32 %v727_v15, %v634_v14  ;;  %v729_v20 = vpop.f32.mrb[15].mxu0 }
 0x168   :  { %v770_v21 = vmul.f32 %v726_v13, %v726_v13  ;;  %v730_v22 = vadd.f32 %v729_v20, %v636_v19  ;;  %1181 = vmatprep.mubr.bf16.mxu0 %v790_v16 }
 0x169   :  { %v759_v23 = vmul.f32 %v728_v18, %v728_v18 }
 0x16a   :  { %v782_v24 = vadd.f32 %v770_v21, %v758_v17  ;;  %v771_v25 = vmul.f32 %v730_v22, %v730_v22 }
 0x16b   :  { %v640_v27 = vpop.f32.mrb[16].mxu1 }
 0x16c   :  { %v783_v26 = vadd.f32 %v771_v25, %v759_v23  ;;  %v733_v28 = vpop.f32.mrb[16].mxu0  ;;  %v642_v30 = vpop.f32.mrb[17].mxu1 }
 0x16d   :  { %v734_v29 = vadd.f32 %v733_v28, %v640_v27  ;;  %v735_v31 = vpop.f32.mrb[17].mxu0  ;;  %v644_v33 = vpop.f32.mrb[18].mxu1 }
 0x16e   :  { %v736_v32 = vadd.f32 %v735_v31, %v642_v30  ;;  %v737_v34 = vpop.f32.mrb[18].mxu0  ;;  %v791_v35 = vpack.c.bf16 %v783_v26, %v782_v24  ;;  %v646_v38 = vpop.f32.mrb[19].mxu1 }
 0x16f   :  { %v760_v36 = vmul.f32 %v734_v29, %v734_v29  ;;  %v738_v37 = vadd.f32 %v737_v34, %v644_v33  ;;  %v739_v39 = vpop.f32.mrb[19].mxu0 }
 0x170   :  { %v772_v40 = vmul.f32 %v736_v32, %v736_v32  ;;  %v740_v41 = vadd.f32 %v739_v39, %v646_v38  ;;  %1182 = vmatmul.mubr.bf16.gmra.mrb[28].mxu0 %v791_v35 }
 0x171   :  { %v761_v42 = vmul.f32 %v738_v37, %v738_v37 }
 0x172   :  { %v784_v43 = vadd.f32 %v772_v40, %v760_v36  ;;  %v773_v44 = vmul.f32 %v740_v41, %v740_v41 }
 0x173   :  { %v650_v46 = vpop.f32.mrb[20].mxu1 }
 0x174   :  { %v785_v45 = vadd.f32 %v773_v44, %v761_v42  ;;  %v743_v47 = vpop.f32.mrb[20].mxu0  ;;  %v652_v49 = vpop.f32.mrb[21].mxu1 }
 0x175   :  { %v744_v48 = vadd.f32 %v743_v47, %v650_v46  ;;  %v745_v50 = vpop.f32.mrb[21].mxu0  ;;  %v654_v52 = vpop.f32.mrb[22].mxu1 }
 0x176   :  { %v746_v51 = vadd.f32 %v745_v50, %v652_v49  ;;  %v747_v53 = vpop.f32.mrb[22].mxu0  ;;  %v792_v54 = vpack.c.bf16 %v785_v45, %v784_v43  ;;  %v656_v57 = vpop.f32.mrb[23].mxu1 }
 0x177   :  { %v762_v55 = vmul.f32 %v744_v48, %v744_v48  ;;  %v748_v56 = vadd.f32 %v747_v53, %v654_v52  ;;  %v749_v58 = vpop.f32.mrb[23].mxu0 }
 0x178   :  { %v774_v59 = vmul.f32 %v746_v51, %v746_v51  ;;  %v750_v60 = vadd.f32 %v749_v58, %v656_v57  ;;  %1185 = vmatprep.mubr.bf16.mxu1 %v792_v54 }
 0x179   :  { %v763_v61 = vmul.f32 %v748_v56, %v748_v56 }
 0x17a   :  { %v786_v62 = vadd.f32 %v774_v59, %v762_v55  ;;  %v775_v63 = vmul.f32 %v750_v60, %v750_v60 }
 0x17c   :  { %v787_v0 = vadd.f32 %v775_v63, %v763_v61 }
 0x17e   :  { %v793_v1 = vpack.c.bf16 %v787_v0, %v786_v62 }
 0x180   :  { %1186 = vmatmul.mubr.bf16.vlgmr.msra.gmra.mrb[24].mxu1 %v793_v1 }
 0x233   :  { %v1179_v2 = vpop.f32.mrb[24].mxu0 }
 0x234   :  { %v1011_v3 = vadd.f32 1e-05, %v1179_v2  ;;  %v892_v4 = vpop.f32.mrb[25].mxu0 }
 0x235   :  { %v1009_v5 = vadd.f32 1e-05, %v892_v4  ;;  %v1180_v6 = vpop.f32.mrb[26].mxu0 }
 0x236   :  { %1341 = vlog2.f32 %v1011_v3  ;;  %v1012_v7 = vadd.f32 1e-05, %v1180_v6  ;;  %v895_v8 = vpop.f32.mrb[27].mxu0 }
 0x237   :  { %1343 = vlog2.f32 %v1009_v5  ;;  %v1010_v9 = vadd.f32 1e-05, %v895_v8 }
 0x238   :  { %1345 = vlog2.f32 %v1012_v7 }
 0x239   :  { %1347 = vlog2.f32 %v1010_v9 }
 0x240   :  { %v1342_v10 = vpop.eup %1341 }
 0x241   :  { %v1344_v11 = vpop.eup %1343  ;;  %v1026_v12 = vmul.f32 0.6931472, %v1342_v10 }
 0x242   :  { %v1346_v13 = vpop.eup %1345  ;;  %v1022_v14 = vmul.f32 0.6931472, %v1344_v11 }
 0x243   :  { %v1348_v15 = vpop.eup %1347  ;;  %1047 = vst [vmem:[#allocation10 + $0x10] sm:$0xff] %v1026_v12  ;;  %v1028_v16 = vmul.f32 0.6931472, %v1346_v13  ;;  %v1183_v17 = vpop.f32.mrb[28].mxu0 }
 0x244   :  { %1045 = vst [vmem:[#allocation10] sm:$0xff] %v1022_v14  ;;  %v1024_v18 = vmul.f32 0.6931472, %v1348_v15  ;;  %v1015_v19 = vadd.f32 1e-05, %v1183_v17  ;;  %v908_v20 = vpop.f32.mrb[29].mxu0 }
 0x245   :  { %1048 = vst [vmem:[#allocation10 + $0x18] sm:$0xff] %v1028_v16  ;;  %v1013_v21 = vadd.f32 1e-05, %v908_v20  ;;  %v1184_v22 = vpop.f32.mrb[30].mxu0 }
 0x246   :  { %1046 = vst [vmem:[#allocation10 + $0x8] sm:$0xff] %v1024_v18  ;;  %1349 = vlog2.f32 %v1015_v19  ;;  %v1016_v23 = vadd.f32 1e-05, %v1184_v22  ;;  %v911_v24 = vpop.f32.mrb[31].mxu0 }
 0x247   :  { %1351 = vlog2.f32 %v1013_v21  ;;  %v1014_v25 = vadd.f32 1e-05, %v911_v24 }
 0x248   :  { %1353 = vlog2.f32 %v1016_v23 }
 0x249   :  { %1355 = vlog2.f32 %v1014_v25 }
 0x250   :  { %v1350_v26 = vpop.eup %1349 }
 0x251   :  { %v1352_v27 = vpop.eup %1351  ;;  %v1034_v28 = vmul.f32 0.6931472, %v1350_v26 }
 0x252   :  { %v1354_v29 = vpop.eup %1353  ;;  %v1030_v30 = vmul.f32 0.6931472, %v1352_v27 }
 0x253   :  { %v1356_v31 = vpop.eup %1355  ;;  %1051 = vst [vmem:[#allocation10 + $0x30] sm:$0xff] %v1034_v28  ;;  %v1036_v32 = vmul.f32 0.6931472, %v1354_v29  ;;  %v1187_v33 = vpop.f32.mrb[24].mxu1 }
 0x254   :  { %1049 = vst [vmem:[#allocation10 + $0x20] sm:$0xff] %v1030_v30  ;;  %v1032_v34 = vmul.f32 0.6931472, %v1356_v31  ;;  %v1019_v35 = vadd.f32 1e-05, %v1187_v33  ;;  %v924_v36 = vpop.f32.mrb[25].mxu1 }
 0x255   :  { %1052 = vst [vmem:[#allocation10 + $0x38] sm:$0xff] %v1036_v32  ;;  %v1017_v37 = vadd.f32 1e-05, %v924_v36  ;;  %v1188_v38 = vpop.f32.mrb[26].mxu1 }
 0x256   :  { %1050 = vst [vmem:[#allocation10 + $0x28] sm:$0xff] %v1032_v34  ;;  %1357 = vlog2.f32 %v1019_v35  ;;  %v1020_v39 = vadd.f32 1e-05, %v1188_v38  ;;  %v927_v40 = vpop.f32.mrb[27].mxu1 }
 0x257   :  { %1359 = vlog2.f32 %v1017_v37  ;;  %v1018_v41 = vadd.f32 1e-05, %v927_v40 }
 0x258   :  { %1361 = vlog2.f32 %v1020_v39 }
 0x259   :  { %1363 = vlog2.f32 %v1018_v41 }
 0x260   :  { %v1358_v42 = vpop.eup %1357 }
 0x261   :  { %v1360_v43 = vpop.eup %1359  ;;  %v1042_v44 = vmul.f32 0.6931472, %v1358_v42 }
 0x262   :  { %v1362_v45 = vpop.eup %1361  ;;  %v1038_v46 = vmul.f32 0.6931472, %v1360_v43 }
 0x263   :  { %v1364_v47 = vpop.eup %1363  ;;  %1055 = vst [vmem:[#allocation10 + $0x50] sm:$0xff] %v1042_v44  ;;  %v1044_v48 = vmul.f32 0.6931472, %v1362_v45 }
 0x264   :  { %1053 = vst [vmem:[#allocation10 + $0x40] sm:$0xff] %v1038_v46  ;;  %v1040_v49 = vmul.f32 0.6931472, %v1364_v47 }
 0x265   :  { %1056 = vst [vmem:[#allocation10 + $0x58] sm:$0xff] %v1044_v48 }
 0x266   :  { %1054 = vst [vmem:[#allocation10 + $0x48] sm:$0xff] %v1040_v49 }
 0x267   :  { %1442 = shalt.err (!%p1439_p0)
}
 0x268   :  { %s1443_s29 = scalar_lea.hbm %s1554_s3, 1536 }
 0x269   :  { %p1444_p1 = scmp.ne.s32.totalorder %s1554_s3, %s1443_s29  ;;  %p1447_p2 = scmp.lt.u32.totalorder %s1443_s29, %s1554_s3 }
 0x26b   :  { %p1449_p3 = pnand %p1447_p2, %p1444_p1 }
 0x26d   :  { %1452 = shalt.err (!%p1449_p3)
}
 0x26e   :  { %1068 = dma.vmem_to_hbm [thread:$0]  %s1063_s23, 1536, %s1554_s3, [#allocation6], %s1461_s24, %s1461_s24, %s1462_s25  }
 0x26f   :  { %1457 = dma.done.wait [#allocation6], 1536  }
 0x270   :  { %1458 = vsyncadd [#allocation6], 4294965760 }
 0x271   :  { %1072 = vsyncpa [#allocation5], 1 }
 0x272   :  { %1073 = vsyncpa [#allocation8], 1 }
 0x273   :  { %1074 = vsyncpa [#allocation6], 1 }

</bundles_post_ra>
